<compile_context>
chip_gen: v7x
topology: tpu7x:2x2x1
jax: 0.10.0
libtpu: 0.0.40
codegen_flags: <defaults>
</compile_context>

<pallas_src>
import math

import jax
import jax.numpy as jnp
import numpy as np
from jax.experimental import pallas as pl
from jax.experimental.pallas import tpu as pltpu


def _cdiv(a, b):
    return (a + b - 1) // b


def _round_up(x, m):
    return ((x + m - 1) // m) * m


def _balanced_tile(extent, align, max_tile):
    """Split `extent` (a multiple of `align`) into `num` equal aligned tiles <= max_tile."""
    num = _cdiv(extent, max_tile)
    tile = _round_up(_cdiv(extent, num), align)
    return tile, num, tile * num


# ---------------------------------------------------------------------------
# Kernels.  x tile: (TM, TK), w tile: (TK, TN), bias tile: (1, TN), out: (TM, TN).
# ---------------------------------------------------------------------------
def _linear_kernel_single_bias(x_ref, w_ref, b_ref, o_ref):
    acc = jnp.dot(x_ref[...], w_ref[...], preferred_element_type=jnp.float32)
    o_ref[...] = (acc + b_ref[...].astype(jnp.float32)).astype(o_ref.dtype)


def _linear_kernel_single_nobias(x_ref, w_ref, o_ref):
    acc = jnp.dot(x_ref[...], w_ref[...], preferred_element_type=jnp.float32)
    o_ref[...] = acc.astype(o_ref.dtype)


def _linear_kernel_acc_bias(x_ref, w_ref, b_ref, o_ref, acc_ref):
    k = pl.program_id(2)

    @pl.when(k == 0)
    def _():
        acc_ref[...] = jnp.zeros_like(acc_ref)

    acc_ref[...] += jnp.dot(x_ref[...], w_ref[...], preferred_element_type=jnp.float32)

    @pl.when(k == pl.num_programs(2) - 1)
    def _():
        o_ref[...] = (acc_ref[...] + b_ref[...].astype(jnp.float32)).astype(o_ref.dtype)


def _linear_kernel_acc_nobias(x_ref, w_ref, o_ref, acc_ref):
    k = pl.program_id(2)

    @pl.when(k == 0)
    def _():
        acc_ref[...] = jnp.zeros_like(acc_ref)

    acc_ref[...] += jnp.dot(x_ref[...], w_ref[...], preferred_element_type=jnp.float32)

    @pl.when(k == pl.num_programs(2) - 1)
    def _():
        o_ref[...] = acc_ref[...].astype(o_ref.dtype)


# ---------------------------------------------------------------------------
# Module wrapper (equivalent of the PyTorch LinearLayer forward).
# ---------------------------------------------------------------------------
class LinearLayer:
    """y = x @ W^T + b with weight prepared once and a fused Pallas matmul per call."""

    _TM_MAX = 512  # rows per output tile

    def __init__(self, weight, bias=None, compute_dtype=jnp.bfloat16):
        weight = jnp.asarray(weight)
        N, K = weight.shape
        self.out_features = int(N)
        self.in_features = int(K)
        self.compute_dtype = compute_dtype

        itemsize = jnp.dtype(compute_dtype).itemsize
        tn_max = 512 if itemsize <= 2 else 256
        tk_max = 2048 if itemsize <= 2 else 1024

        # Balanced, lane/sublane-aligned tiling of the weight dims (fixed once here).
        n128 = _round_up(N, 128)
        self._tn, self._num_n, self._n_pad = _balanced_tile(n128, 128, tn_max)
        k128 = _round_up(K, 128)          # K padded to 128 (clean lanes / bf16 packing)
        self._tk, self._num_k, self._k_pad = _balanced_tile(k128, 128, tk_max)

        # One-time weight prep (hoisted out of the per-call path): transpose to (K, N),
        # zero-pad to (K_pad, N_pad), cast to the MXU operand dtype.
        w = weight.T
        if (self._k_pad, self._n_pad) != (K, N):
            w = jnp.pad(w, ((0, self._k_pad - K), (0, self._n_pad - N)))
        self._w = w.astype(compute_dtype)

        if bias is not None:
            b = jnp.asarray(bias).astype(jnp.float32)
            if self._n_pad != N:
                b = jnp.pad(b, (0, self._n_pad - N))
            self._b = b.reshape(1, self._n_pad)
        else:
            self._b = None
        # TODO(synk): optional int8 (v5e/v6e) / fp8 (v7x) weight path with per-channel
        # dequant fused into the epilogue for weight-bandwidth-bound (small-M) shapes.

    def __call__(self, x):
        *lead, K = x.shape
        assert K == self.in_features, "x last dim must equal in_features"
        M = math.prod(lead) if lead else 1
        N = self.out_features
        out_dtype = x.dtype

        x2 = x.reshape(M, K).astype(self.compute_dtype)

        m8 = _round_up(M, 8)
        tm, num_m, m_pad = _balanced_tile(m8, 8, self._TM_MAX)
        tn, num_n, n_pad = self._tn, self._num_n, self._n_pad
        tk, num_k, k_pad = self._tk, self._num_k, self._k_pad

        # v7x shards "parallel" grid axes over 2 TensorCores: make sure there are >= 2
        # programs on them when M allows (costless on single-TC v5e/v6e).
        if num_m * num_n == 1 and m8 >= 16:
            num_m = 2
            tm = _round_up(_cdiv(m8, 2), 8)
            m_pad = tm * num_m

        if (m_pad, k_pad) != (M, K):
            x2 = jnp.pad(x2, ((0, m_pad - M), (0, k_pad - K)))

        has_bias = self._b is not None
        multi_k = num_k > 1

        # VMEM budget for the chosen tiles (double-buffered inputs/outputs + scratch).
        in_item = jnp.dtype(self.compute_dtype).itemsize
        out_item = jnp.dtype(out_dtype).itemsize
        vmem_bytes = (
            2 * (tm * tk + tk * tn) * in_item        # double-buffered x / w tiles
            + 2 * tm * tn * out_item                 # double-buffered output tile
            + (tm * tn * 4 if multi_k else 0)        # f32 accumulator scratch
            + (2 * tn * 4 if has_bias else 0)        # bias tile
        )
        vmem_limit = int(min(100 << 20, max(32 << 20, 2 * vmem_bytes)))

        if multi_k:
            grid = (num_m, num_n, num_k)
            in_specs = [
                pl.BlockSpec((tm, tk), lambda i, j, k: (i, k)),
                # (If a trace shows exposed weight DMA: pipeline_mode=pl.Buffered(3) here.)
                pl.BlockSpec((tk, tn), lambda i, j, k: (k, j)),
            ]
            if has_bias:
                in_specs.append(pl.BlockSpec((1, tn), lambda i, j, k: (0, j)))
            out_spec = pl.BlockSpec((tm, tn), lambda i, j, k: (i, j))
            scratch = [pltpu.VMEM((tm, tn), jnp.float32)]
            kernel = _linear_kernel_acc_bias if has_bias else _linear_kernel_acc_nobias
            dims = ("parallel", "parallel", "arbitrary")
        else:
            grid = (num_m, num_n)
            in_specs = [
                pl.BlockSpec((tm, tk), lambda i, j: (i, 0)),
                pl.BlockSpec((tk, tn), lambda i, j: (0, j)),
            ]
            if has_bias:
                in_specs.append(pl.BlockSpec((1, tn), lambda i, j: (0, j)))
            out_spec = pl.BlockSpec((tm, tn), lambda i, j: (i, j))
            scratch = []
            kernel = (_linear_kernel_single_bias if has_bias
                      else _linear_kernel_single_nobias)
            dims = ("parallel", "parallel")

        operands = (x2, self._w) + ((self._b,) if has_bias else ())

        out = pl.pallas_call(
            kernel,
            out_shape=jax.ShapeDtypeStruct((m_pad, n_pad), out_dtype),
            grid_spec=pltpu.PrefetchScalarGridSpec(
                num_scalar_prefetch=0,
                grid=grid,
                in_specs=in_specs,
                out_specs=out_spec,
                scratch_shapes=scratch,
            ),
            compiler_params=pltpu.CompilerParams(
                dimension_semantics=dims,
                vmem_limit_bytes=vmem_limit,
            ),
        )(*operands)

        out = out[:M, :N]
        return out.reshape(*lead, N) if lead else out.reshape(N)


if __name__ == "__main__":
    key = jax.random.PRNGKey(0)
    k1, k2, k3, k4, k5, k6, k7 = jax.random.split(key, 7)

    # LinearLayer(in_features=32, out_features=64) applied to x of shape (2, 8, 32).
    B, S, Kf, Nf = 2, 8, 32, 64
    bound = math.sqrt(6.0 / (Kf + Nf))  # xavier_uniform_ range, as in reset_params()
    x = jax.random.normal(k1, (B, S, Kf), jnp.float32)
    w = jax.random.uniform(k2, (Nf, Kf), jnp.float32, -bound, bound)
    b = jax.random.normal(k3, (Nf,), jnp.float32) * 0.1
    ref = jnp.einsum("bsk,nk->bsn", x, w) + b

    # Default: bf16 MXU operands, f32 accumulation.
    layer = LinearLayer(w, b)
    out = jax.block_until_ready(layer(x))
    assert out.shape == (B, S, Nf)
    np.testing.assert_allclose(np.asarray(out), np.asarray(ref), rtol=3e-2, atol=3e-2)

    # Opt-in f32 MXU operands — tight tolerance.
    layer_f32 = LinearLayer(w, b, compute_dtype=jnp.float32)
    out_f32 = jax.block_until_ready(layer_f32(x))
    np.testing.assert_allclose(np.asarray(out_f32), np.asarray(ref), rtol=5e-3, atol=5e-3)

    # Unaligned features + no bias: exercises padding and the bias-free kernel.
    x2 = jax.random.normal(k4, (3, 5, 20), jnp.float32)
    w2 = jax.random.uniform(k5, (48, 20), jnp.float32, -0.3, 0.3)
    layer2 = LinearLayer(w2, None)
    out2 = jax.block_until_ready(layer2(x2))
    ref2 = jnp.einsum("bsk,nk->bsn", x2, w2)
    assert out2.shape == (3, 5, 48)
    np.testing.assert_allclose(np.asarray(out2), np.asarray(ref2), rtol=3e-2, atol=3e-2)

    # Wide K forces the K-tiled accumulator path (grid K extent > 1).
    Kw = 2100
    x3 = jax.random.normal(k6, (2, 4, Kw), jnp.float32) / math.sqrt(Kw)
    w3 = jax.random.uniform(k7, (64, Kw), jnp.float32, -0.05, 0.05)
    layer3 = LinearLayer(w3, None, compute_dtype=jnp.float32)
    out3 = jax.block_until_ready(layer3(x3))
    ref3 = jnp.einsum("bsk,nk->bsn", x3, w3)
    assert out3.shape == (2, 4, 64)
    np.testing.assert_allclose(np.asarray(out3), np.asarray(ref3), rtol=1e-2, atol=1e-2)

    print("KERNEL_OK")
</pallas_src>

<mosaic_0001>
module attributes {stable_mosaic.version = 11 : i64} {
  func.func @_linear_kernel_single_bias(%arg0: i32, %arg1: i32, %arg2: memref<8x128xbf16, #tpu.memory_space<vmem>>, %arg3: memref<128x128xbf16, #tpu.memory_space<vmem>>, %arg4: memref<1x128xf32, #tpu.memory_space<vmem>>, %arg5: memref<8x128xf32, #tpu.memory_space<vmem>>) attributes {dimension_semantics = [#tpu.dimension_semantics<parallel>, #tpu.dimension_semantics<parallel>], iteration_bounds = array<i64: 2, 1>, scalar_prefetch = 0 : i64, scratch_operands = 0 : i64, tpu.core_type = #tpu.core_type<tc>, window_params = [{transform_indices = @transform_0, window_bounds = array<i64: 8, 128>}, {transform_indices = @transform_1, window_bounds = array<i64: 128, 128>}, {transform_indices = @transform_2, window_bounds = array<i64: 1, 128>}, {transform_indices = @transform_3, window_bounds = array<i64: 8, 128>}]} {
    %c0 = arith.constant 0 : index
    %c0_0 = arith.constant 0 : index
    %0 = vector.load %arg2[%c0, %c0_0] : memref<8x128xbf16, #tpu.memory_space<vmem>>, vector<8x128xbf16>
    %c0_1 = arith.constant 0 : index
    %c0_2 = arith.constant 0 : index
    %1 = vector.load %arg3[%c0_1, %c0_2] : memref<128x128xbf16, #tpu.memory_space<vmem>>, vector<128x128xbf16>
    %cst = arith.constant dense<0.000000e+00> : vector<8x128xf32>
    %2 = tpu.matmul %0, %1, %cst {dimension_numbers = #tpu.dot_dimension_numbers<[1], [0], [0], [1], [0, 0, 1, 1], [], []>} : vector<8x128xbf16>, vector<128x128xbf16>, vector<8x128xf32> -> vector<8x128xf32>
    %c0_3 = arith.constant 0 : index
    %c0_4 = arith.constant 0 : index
    %3 = vector.load %arg4[%c0_3, %c0_4] : memref<1x128xf32, #tpu.memory_space<vmem>>, vector<1x128xf32>
    %4 = vector.broadcast %3 : vector<1x128xf32> to vector<8x128xf32>
    %5 = arith.addf %2, %4 : vector<8x128xf32>
    %c0_5 = arith.constant 0 : index
    %c0_6 = arith.constant 0 : index
    %6 = vector.load %arg5[%c0_5, %c0_6] : memref<8x128xf32, #tpu.memory_space<vmem>>, vector<8x128xf32>
    tpu.vector_store %arg5[%c0_5, %c0_6], %5 {strides = array<i32>} : memref<8x128xf32, #tpu.memory_space<vmem>>, vector<8x128xf32>,
    return
  }
  func.func @transform_0(%arg0: i32, %arg1: i32) -> (i32, i32) {
    %c0_i32 = arith.constant 0 : i32
    %c0_i32_0 = arith.constant 0 : i32
    return %arg0, %c0_i32 : i32, i32
  }
  func.func @transform_1(%arg0: i32, %arg1: i32) -> (i32, i32) {
    %c0_i32 = arith.constant 0 : i32
    %c0_i32_0 = arith.constant 0 : i32
    return %c0_i32, %arg1 : i32, i32
  }
  func.func @transform_2(%arg0: i32, %arg1: i32) -> (i32, i32) {
    %c0_i32 = arith.constant 0 : i32
    %c0_i32_0 = arith.constant 0 : i32
    return %c0_i32, %arg1 : i32, i32
  }
  func.func @transform_3(%arg0: i32, %arg1: i32) -> (i32, i32) {
    %c0_i32 = arith.constant 0 : i32
    return %arg0, %arg1 : i32, i32
  }
}

</mosaic_0001>

<bundles_post_ra>
// kernel: tpu_custom_call.1
= control target key start
LH: loop header
LB: loop body
LE: loop exit
PB: predicated region body
PF: predicated region fallthrough
CT: control target
= control target key end

     0   :  { %8 = vsyncpa [#allocation3], 0  ;;  %s1001_s0 = inlined_call_operand.hbm [shape: bf16[16,128], index: 0, kind: input, shape index: {}]   ;;  %s1002_s1 = inlined_call_operand.hbm [shape: bf16[128,128], index: 1, kind: input, shape index: {}]   ;;  %s1003_s2 = inlined_call_operand.vmem [shape: f32[1,128], index: 2, kind: input, shape index: {}]   ;;  %s1004_s3 = inlined_call_operand.hbm [shape: f32[16,128], index: 3, kind: output, shape index: {}]  }
   0x1   :  { %10 = vsyncpa [#allocation3 + $0x1], 0 }
   0x2   :  { %11 = vsyncpa [#allocation6], 0 }
   0x3   :  { %12 = vsyncpa [#allocation4], 0 }
   0x4   :  { %14 = vsyncpa [#allocation4 + $0x1], 0  ;;  %s780_s12 = smov 0   ;;  %s782_s13 = smov 0  }
   0x5   :  { %s784_s14 = smov 0   ;;  %s786_s15 = smov 0  }
   0x6   :  { %s788_s16 = smov 0   ;;  %s790_s17 = smov 0  }
   0x7 LB: > { %s468_s18 = sadd.s32 4294967295, %s751_s17   ;;  %s469_s19 = sadd.s32 4294967294, %s751_s17   ;;  %s751_s17 = sphi %s790_s17, %s20_s17   ;;  %s747_s16 = sphi %s788_s16, %s1028_s16   ;;  %s743_s15 = sphi %s786_s15, %s1027_s15   ;;  %s739_s14 = sphi %s784_s14, %s1026_s14   ;;  %s735_s13 = sphi %s782_s13, %s1025_s13   ;;  %s731_s12 = sphi %s780_s12, %s1024_s12  }
   0x8   : > { %p52_p0 = scmp.ne.s32.totalorder %s735_s13, %s731_s12  ;;  %p814_p1 = scmp.eq.s32.totalorder %s468_s18, 0 }
   0x9   : > { %p818_p2 = scmp.eq.s32.totalorder %s468_s18, 1  ;;  %p136_p3 = scmp.eq.s32.totalorder %s469_s19, 1 }
   0xa   : > { %s1009_s20 = scalar_select %p814_p1, 1, 0 }
   0xb   : > { %s1010_s21 = scalar_select %p818_p2, 1, 0 }
   0xc   : > { %p824_p4 = por %p814_p1, %p52_p0  ;;  %p470_p5 = scmp.ge.s32.totalorder %s751_s17, 1 }
   0xd   : > { %p829_p6 = por %p136_p3, %p52_p0  ;;  %p143_p7 = scmp.lt.s32.totalorder %s751_s17, 3 }
   0xe   : > { %s1011_s22 = scalar_select %p824_p4, 1, 0 }
   0xf   : > { %s1012_s23 = scalar_select %p829_p6, 1, 0 }
  0x10   : > { %p834_p8 = pnand %p470_p5, %p143_p7  ;;  %s753_s25 = smov [#allocation5]  }
  0x11   : > { %s157_s26 = sshll.u32 %s753_s25, 4  ;;  %s32_s28 = sadd.s32 1, %s747_s16  ;;  %s158_s26 = int_to_ptr.vmem [resolvable:$true] %s157_s26 }
  0x12   : > { %s1013_s24 = scalar_select %p834_p8, 1, 0 }
  0x13   : > { %p530_p9 = pneg %p834_p8  ;;  %s607_s4 = scalar_lea.hbm %s1002_s1, 1024 }
  0x14   : > { %p608_p12 = scmp.ne.s32.totalorder %s1002_s1, %s607_s4  ;;  %p614_p5 = scmp.lt.u32.totalorder %s607_s4, %s1002_s1 }
  0x15   : > { %p843_p11 = pnand %p530_p9, %p814_p1 }
  0x17   : > { %p609_p13 = pneg %p843_p11 }
  0x19   : > { %p610_p0 = pnand %p609_p13, %p608_p12 }
  0x1b   : > { %p611_p3 = pneg %p610_p0 }
  0x1d   : > { %p616_p7 = pnand %p614_p5, %p611_p3 }
  0x1f   : > { %619 = shalt.err (!%p616_p7)
}
  0x20   : > { %s620_s9 = scalar_lea.vmem %s158_s26, 1024  ;;  %p628_p1 = scmp.lt.s32.totalorder %s158_s26, %s158_s26 }
  0x21   : > { %p621_p9 = scmp.ne.s32.totalorder %s158_s26, %s620_s9  ;;  %p629_p4 = scmp.lt.s32.totalorder %s620_s9, %s620_s9 }
  0x23   : > { %p623_p10 = pnand %p621_p9, %p609_p13  ;;  %p630_p8 = por %p629_p4, %p628_p1 }
  0x25   : > { %p624_p6 = pneg %p623_p10 }
  0x27   : > { %p631_p2 = pnand %p630_p8, %p624_p6 }
  0x29   : > { %634 = shalt.err (!%p631_p2)
}
  0x2a   : > { %s754_s10 = smov 64   ;;  %s755_s11 = smov 4  }
  0x2b   : > { %533 = dma.hbm_to_vmem [thread:$0]  (!%p843_p11), %s1002_s1, 1024, %s158_s26, [#allocation6], %s754_s10, %s754_s10, %s755_s11  }
  0x2c   : > { %p34_p1 = scmp.ge.s32.totalorder %s32_s28, 2  ;;  %s39_s25 = sadd.s32 1, %s739_s14 }
  0x2d   : > { %p46_p2 = scmp.ne.s32.totalorder %s739_s14, %s735_s13  ;;  %p47_p4 = scmp.eq.s32.totalorder %s751_s17, 0 }
  0x2e   : > { %s1030_s28 = smov (%p34_p1, %s32_s28), 0  ;;  %p1016_p8 = scmp.ne.s32.totalorder %s1010_s21, 0 }
  0x2f   : > { %p870_p6 = por %p47_p4, %p46_p2  ;;  %s36_s27 = ssub.s32 %s747_s16, %s1030_s28 }
  0x30   : > { %p876_p10 = por %p1016_p8, %p46_p2  ;;  %p543_p12 = scmp.lt.s32.totalorder %s751_s17, 2 }
  0x31   : > { %p37_p11 = scmp.eq.s32.totalorder %s36_s27, 0  ;;  %s177_s26 = sand.u32 1, %s739_s14  }
  0x32   : > { %s474_s4 = sshll.u32 %s177_s26, 2  ;;  %s475_s6 = sshll.u32 %s747_s16, 6 }
  0x33   : > { %s885_s5 = scalar_select %p37_p11, %s739_s14, %s39_s25  }
  0x34   : > { %s891_s9 = scalar_lea.hbm %s1001_s0, %s475_s6  ;;  %s181_s21 = scalar_lea.vmem [#allocation2], %s474_s4 }
  0x35   : > { %s188_s10 = sshll.u32 %s181_s21, 4  ;;  %p897_p13 = pnand %p543_p12, %p870_p6  ;;  %s893_s10 = int_to_ptr.vmem [resolvable:$true] %s188_s10 }
  0x36   : > { %s178_s18 = scalar_lea.sflag [#allocation3], %s177_s26  ;;  %s635_s19 = scalar_lea.hbm %s891_s9, 64 }
  0x37   : > { %p636_p0 = scmp.ne.s32.totalorder %s891_s9, %s635_s19  ;;  %p637_p3 = pneg %p897_p13 }
  0x38   : > { %s640_s4 = scalar_lea.hbm %s1001_s0, 128  ;;  %p641_p9 = scmp.lt.u32.totalorder %s891_s9, %s1001_s0 }
  0x39   : > { %p638_p5 = pnand %p637_p3, %p636_p0  ;;  %p642_p1 = scmp.lt.u32.totalorder %s640_s4, %s635_s19 }
  0x3a   : > { %p644_p4 = scmp.lt.u32.totalorder %s635_s19, %s891_s9 }
  0x3b   : > { %p639_p7 = pneg %p638_p5  ;;  %p643_p2 = por %p642_p1, %p641_p9 }
  0x3d   : > { %p645_p6 = por %p644_p4, %p643_p2 }
  0x3f   : > { %p646_p8 = pnand %p645_p6, %p639_p7 }
  0x41   : > { %649 = shalt.err (!%p646_p8)
}
  0x42   : > { %s650_s26 = scalar_lea.vmem %s893_s10, 64  ;;  %s756_s7 = smov [#allocation2]  }
  0x43   : > { %p651_p12 = scmp.ne.s32.totalorder %s893_s10, %s650_s26  ;;  %s655_s8 = sshll.u32 %s756_s7, 4  ;;  %s656_s8 = int_to_ptr.vmem [resolvable:$false] %s655_s8 }
  0x44   : > { %s657_s21 = scalar_lea.vmem %s656_s8, 128  ;;  %p658_p5 = scmp.lt.s32.totalorder %s893_s10, %s656_s8 }
  0x45   : > { %p653_p11 = pnand %p651_p12, %p637_p3  ;;  %p659_p9 = scmp.lt.s32.totalorder %s657_s21, %s650_s26 }
  0x47   : > { %p654_p0 = pneg %p653_p11  ;;  %p660_p1 = por %p659_p9, %p658_p5 }
  0x49   : > { %p661_p2 = pnand %p660_p1, %p654_p0 }
  0x4b   : > { %664 = shalt.err (!%p661_p2)
}
  0x4c   : > { %537 = dma.hbm_to_vmem [thread:$0]  (!%p897_p13), %s891_s9, 64, %s893_s10, %s178_s18  }
  0x4d   : > { %p1019_p7 = scmp.ne.s32.totalorder %s1013_s24, 0 }
  0x4e   : > { %s929_s19 = sand.u32 (!%p1019_p7), 1, %s735_s13   ;;  %p1020_p3 = scmp.ne.s32.totalorder (!%p1019_p7), %s1011_s22, 0 }
  0x4f   : > { %197 = sbr.rel (%p1019_p7) target bundleno = 351 (0x15f), region = 32  ;;  %s477_s25 = sshll.u32 (!%p1019_p7), %s929_s19, 2 }
  0x50   : > { %s200_s27 = scalar_lea.sflag (!%p1019_p7), [#allocation3], %s929_s19  ;;  %s933_s4 = scalar_lea.vmem (!%p1019_p7), [#allocation2], %s477_s25 }
  0x56   : > { %718 = dma.done.wait (%p1020_p3), %s200_s27, 64  }
  0x57   : > { %720 = vsyncadd (%p1020_p3), %s200_s27, 4294967232  ;;  %p1021_p13 = scmp.ne.s32.totalorder %s1009_s20, 0 }
  0x59   : > { %722 = dma.done.wait (%p1021_p13), [#allocation6], 1024  }
  0x5a   : > { %724 = vsyncadd (%p1021_p13), [#allocation6], 4294966272  ;;  %v757_v0 = vmov 0.0   ;;  %vm758_vm0 = vmmov 0   ;;  %v599_v1 = vld [vmem:[#allocation5] sm:$0xff]   ;;  %v600_v2 = vld [vmem:[#allocation5 + $0x8] sm:$0xff]  }
  0x5b   : > { %502 = vmatprep.subr.bf16.mxu0 %v757_v0  ;;  %518 = vmatprep.mubr.msk.bf16.mxu0 %vm758_vm0, %v757_v0  ;;  %v601_v3 = vld [vmem:[#allocation5 + $0x10] sm:$0xff]   ;;  %v602_v4 = vld [vmem:[#allocation5 + $0x18] sm:$0xff]   ;;  %v603_v5 = vld [vmem:[#allocation5 + $0x20] sm:$0xff]   ;;  %s479_s20 = sshll.u32 %s929_s19, 3  ;;  %s490_s9 = sshll.u32 %s743_s15, 7 }
  0x5c   : > { %503 = vmatpush3.bf16.msra.mxu0 %v599_v1  ;;  %v604_v6 = vld [vmem:[#allocation5 + $0x28] sm:$0xff]   ;;  %v605_v7 = vld [vmem:[#allocation5 + $0x30] sm:$0xff]   ;;  %v606_v8 = vld [vmem:[#allocation5 + $0x38] sm:$0xff]   ;;  %s232_s10 = scalar_lea.vmem [#allocation7], %s479_s20  ;;  %s952_s6 = scalar_lea.hbm %s1004_s3, %s490_s9 }
  0x5d   : > { %504 = vmatprep.subr.bf16.mxu0 %v757_v0  ;;  %v237_v9 = vld [vmem:[%s933_s4] sm:$0xf]  ;;  %s365_s11 = sshll.u32 %s232_s10, 4  ;;  %s351_s26 = scalar_lea.sflag [#allocation4], %s929_s19  ;;  %s954_s11 = int_to_ptr.vmem [resolvable:$true] %s365_s11 }
  0x5e   : > { %v480_v10 = vld [vmem:[%s1003_s2] ss:$0 sm:$0xff]  ;;  %s665_s15 = scalar_lea.vmem %s954_s11, 128  ;;  %s759_s7 = smov [#allocation7]  }
  0x5f   : > { %p666_p4 = scmp.ne.s32.totalorder %s954_s11, %s665_s15  ;;  %s669_s8 = sshll.u32 %s759_s7, 4  ;;  %s670_s8 = int_to_ptr.vmem [resolvable:$false] %s669_s8 }
  0x60   : > { %505 = vmatpush3.bf16.msra.mxu0 %v600_v2  ;;  %s671_s21 = scalar_lea.vmem %s670_s8, 256  ;;  %p672_p12 = scmp.lt.s32.totalorder %s954_s11, %s670_s8 }
  0x61   : > { %506 = vmatprep.subr.bf16.mxu0 %v757_v0  ;;  %p667_p6 = pnand %p666_p4, %p876_p10  ;;  %p673_p11 = scmp.lt.s32.totalorder %s671_s21, %s665_s15 }
  0x63   : > { %p668_p8 = pneg %p667_p6  ;;  %p674_p0 = por %p673_p11, %p672_p12 }
  0x64   : > { %507 = vmatpush3.bf16.msra.mxu0 %v601_v3 }
  0x65   : > { %508 = vmatprep.subr.bf16.mxu0 %v757_v0  ;;  %p675_p5 = pnand %p674_p0, %p668_p8 }
  0x68   : > { %509 = vmatpush3.bf16.msra.mxu0 %v602_v4 }
  0x69   : > { %510 = vmatprep.subr.bf16.mxu0 %v757_v0 }
  0x6c   : > { %511 = vmatpush3.bf16.msra.mxu0 %v603_v5 }
  0x6d   : > { %512 = vmatprep.subr.bf16.mxu0 %v757_v0 }
  0x70   : > { %513 = vmatpush3.bf16.msra.mxu0 %v604_v6 }
  0x71   : > { %514 = vmatprep.subr.bf16.mxu0 %v757_v0 }
  0x74   : > { %515 = vmatpush3.bf16.msra.mxu0 %v605_v7 }
  0x75   : > { %516 = vmatprep.subr.bf16.mxu0 %v757_v0 }
  0x78   : > { %517 = vmatpush3.bf16.msra.mxu0 %v606_v8 }
  0x7b   : > { %519 = vmatmul.mubr.bf16.vlgmr.msra.gmra.mrb[0].mxu0 %v237_v9 }
 0x14e   : > { %v343_v11 = vpop.f32.mrb[0].mxu0 }
 0x14f   : > { %v344_v12 = vadd.f32 %v480_v10, %v343_v11  ;;  %v520_v13 = vpop.f32.mrb[1].mxu0 }
 0x150   : > { %v346_v14 = vpop.f32.mrb[2].mxu0 }
 0x151   : > { %349 = vst [vmem:[%s232_s10] sm:$0xff] %v344_v12  ;;  %v521_v15 = vpop.f32.mrb[3].mxu0 }
 0x152   : > { %678 = shalt.err (!%p675_p5)
}
 0x153   : > { %s679_s19 = scalar_lea.hbm %s952_s6, 128  ;;  %s683_s4 = scalar_lea.hbm %s1004_s3, 256 }
 0x154   : > { %p680_p9 = scmp.ne.s32.totalorder %s952_s6, %s679_s19  ;;  %p684_p7 = scmp.lt.u32.totalorder %s952_s6, %s1004_s3 }
 0x155   : > { %p685_p3 = scmp.lt.u32.totalorder %s683_s4, %s679_s19  ;;  %p687_p4 = scmp.lt.u32.totalorder %s679_s19, %s952_s6 }
 0x156   : > { %p681_p1 = pnand %p680_p9, %p876_p10 }
 0x157   : > { %p686_p13 = por %p685_p3, %p684_p7 }
 0x158   : > { %p682_p2 = pneg %p681_p1 }
 0x159   : > { %p688_p6 = por %p687_p4, %p686_p13 }
 0x15b   : > { %p689_p8 = pnand %p688_p6, %p682_p2 }
 0x15d   : > { %692 = shalt.err (!%p689_p8)
}
 0x15e   : > { %528 = dma.vmem_to_hbm [thread:$0]  (%p876_p10), %s954_s11, 128, %s952_s6, %s351_s26  }
 0x15f PF: > { %s377_s24 = sand.u32 1, %s731_s12   ;;  %p1022_p12 = scmp.ne.s32.totalorder %s1012_s23, 0 }
 0x160   : > { %p1023_p11 = scmp.ge.s32.totalorder %s751_s17, 2  ;;  %s378_s9 = scalar_lea.sflag [#allocation4], %s377_s24 }
 0x162   : > { %p539_p0 = pnand %p1023_p11, %p1022_p12 }
 0x164   : > { %726 = dma.done.wait (!%p539_p0), %s378_s9, 128  }
 0x165   : > { %728 = vsyncadd (!%p539_p0), %s378_s9, 4294967168  ;;  %s20_s17 = sadd.s32 1, %s751_s17   ;;  %s1024_s12 = smov %s735_s13 }
 0x166   : > { %p17_p5 = scmp.ge.s32.totalorder %s20_s17, 4   ;;  %s1025_s13 = smov %s739_s14 }
 0x167   : > { %s1026_s14 = smov %s885_s5  ;;  %s1027_s15 = smov %s747_s16 }
 0x168   : > { %s1028_s16 = smov %s1030_s28  ;;  %19 = sbr.rel (!%p17_p5) target bundleno = 7 (0x7), region = 85 }
 0x16f   :  { %383 = vsyncpa [#allocation3], 1 }
 0x170   :  { %385 = vsyncpa [#allocation3 + $0x1], 1 }
 0x171   :  { %386 = vsyncpa [#allocation6], 1 }
 0x172   :  { %387 = vsyncpa [#allocation4], 1 }
 0x173   :  { %389 = vsyncpa [#allocation4 + $0x1], 1 }

</bundles_post_ra>
